<compile_context>
chip_gen: v6e
topology: v6e:2x2x1
jax: 0.10.0
libtpu: 0.0.40
codegen_flags: <defaults>
</compile_context>

<pallas_src>
import numpy as np

import jax
import jax.numpy as jnp
from jax.experimental import pallas as pl
from jax.experimental.pallas import tpu as pltpu

LANE = 128
NEG_BIG = -1e30   # "minus infinity" used for masking non-edges
M_INIT = -1e4     # finite sentinel for the running max: exp(NEG_BIG - m) == 0 exactly


def _round_up(x, m):
    return (x + m - 1) // m * m


def _pick_node_tiling(n):
    """Pad the node count and pick (dst, src) tile sizes.

    src tile: up to 512 (HBM-roofline sweet spot); dst tile: same, but capped so the
    parallel dst grid axis has >= 2 tiles whenever possible (v7x has 2 TCs/chip).
    """
    n_pad = _round_up(max(n, 1), LANE)
    if n_pad >= 512:
        n_pad = _round_up(n_pad, 512)
        tile_src = 512
    else:
        tile_src = n_pad
    tile_dst = tile_src
    if n_pad // tile_dst < 2:
        for cand in (256, 128):
            if n_pad % cand == 0 and n_pad // cand >= 2:
                tile_dst = cand
                break
    return n_pad, tile_dst, tile_src


def _vmem_budget():
    """Generation-gated VMEM limit (bytes). Conservative default = v7x (64 MiB/TC)."""
    cap = 64 * 1024 * 1024
    try:
        info = pltpu.get_tpu_info()
        cap = int(getattr(info, "vmem_capacity_bytes", cap))
    except Exception:
        pass
    return max(32 * 1024 * 1024, min(cap - 16 * 1024 * 1024, 96 * 1024 * 1024))


# ----------------------------- projection: h = x @ W_aug -----------------------------
def project(x_bf16, w_bf16, c_real, tile_rows):
    """First layer projection. Emits h (bf16) plus the two attention-logit columns
    a_src / a_dst as separate f32 (n_pad, 1) outputs (no wrapper column gathers)."""
    n_pad, f_pad = x_bf16.shape
    c_pad = w_bf16.shape[1]

    def kernel(x_ref, w_ref, h_ref, asrc_ref, adst_ref):
        res = jnp.dot(x_ref[...], w_ref[...], preferred_element_type=jnp.float32)
        h_ref[...] = res.astype(h_ref.dtype)
        asrc_ref[...] = res[:, c_real:c_real + 1]
        adst_ref[...] = res[:, c_real + 1:c_real + 2]

    return pl.pallas_call(
        kernel,
        out_shape=(jax.ShapeDtypeStruct((n_pad, c_pad), jnp.bfloat16),
                   jax.ShapeDtypeStruct((n_pad, 1), jnp.float32),
                   jax.ShapeDtypeStruct((n_pad, 1), jnp.float32)),
        grid=(n_pad // tile_rows,),
        in_specs=[pl.BlockSpec((tile_rows, f_pad), lambda i: (i, 0)),
                  pl.BlockSpec((f_pad, c_pad), lambda i: (0, 0))],
        out_specs=[pl.BlockSpec((tile_rows, c_pad), lambda i: (i, 0)),
                   pl.BlockSpec((tile_rows, 1), lambda i: (i, 0)),
                   pl.BlockSpec((tile_rows, 1), lambda i: (i, 0))],
        compiler_params=pltpu.CompilerParams(
            dimension_semantics=("parallel",)),
    )(x_bf16, w_bf16)


# ------------------- GAT aggregation (online softmax) + fused epilogue -------------------
def gat_aggregate(h_aug, a_src_row, a_dst_col, adj_p, bias_row,
                  cols, row_nnz, max_blk, w_next, next_real,
                  tile_dst, tile_src, h_resident, vmem_limit):
    """One GATConv layer: masked attention over a (dst-block, nonzero-src-block) grid
    with online softmax; epilogue fuses bias + ReLU (+ the next layer's projection and
    its attention-logit columns when w_next is given)."""
    n_pad, c_pad = h_aug.shape
    fuse = w_next is not None
    nbi = n_pad // tile_dst
    grid = (nbi, max_blk)

    def kernel(*refs):
        if fuse:
            (cols_ref, nnz_ref, adst_ref, asrc_ref, h_ref, adj_ref, bias_ref,
             wnext_ref, o_ref, osrc_ref, odst_ref, m_ref, l_ref, acc_ref) = refs
        else:
            (cols_ref, nnz_ref, adst_ref, asrc_ref, h_ref, adj_ref, bias_ref,
             o_ref, m_ref, l_ref, acc_ref) = refs
            wnext_ref = osrc_ref = odst_ref = None

        i = pl.program_id(0)
        j = pl.program_id(1)

        @pl.when(j == 0)
        def _init():
            m_ref[...] = jnp.full_like(m_ref, M_INIT)
            l_ref[...] = jnp.zeros_like(l_ref)
            acc_ref[...] = jnp.zeros_like(acc_ref)

        # only the first nnz_ref[i] steps of the src axis carry real blocks
        @pl.when(j < nnz_ref[i])
        def _update():
            mask = adj_ref[...] != 0
            # e[d, s] = LeakyReLU(a_dst[d] + a_src[s]), negative_slope=0.2 (GATConv default)
            e = adst_ref[...] + asrc_ref[...]            # (Td,1)+(1,Ts) -> (Td,Ts) f32
            e = jnp.where(e > 0, e, 0.2 * e)
            e = jnp.where(mask, e, NEG_BIG)

            # online (flash-style) softmax over incoming edges
            m_prev = m_ref[...]
            m_new = jnp.maximum(m_prev, jnp.max(e, axis=-1, keepdims=True))
            corr = jnp.exp(m_prev - m_new)
            # m_new >= M_INIT (finite), so exp(NEG_BIG - m_new) underflows to exactly 0:
            # no second mask-select is needed on p.
            p = jnp.exp(e - m_new)

            if h_resident:
                src_blk = cols_ref[i * max_blk + j]
                start = pl.multiple_of(src_blk * tile_src, 128)
                h_src = h_ref[pl.ds(start, tile_src), :]
            else:
                h_src = h_ref[...]

            l_ref[...] = corr * l_ref[...] + jnp.sum(p, axis=-1, keepdims=True)
            acc_ref[...] = corr * acc_ref[...] + jnp.dot(
                p.astype(h_src.dtype), h_src, preferred_element_type=jnp.float32)
            m_ref[...] = m_new

        @pl.when(j == pl.num_programs(1) - 1)
        def _finish():
            l = l_ref[...]
            # guard isolated / padded destination rows (l == 0) against NaN
            inv_l = pl.reciprocal(jnp.where(l > 0.0, l, 1.0), approx=True)
            y = jnp.maximum(acc_ref[...] * inv_l + bias_ref[...], 0.0)  # + fused ReLU
            # F.dropout(x, training=False) is the identity in eval mode: nothing to do.
            if fuse:
                # fuse next layer's x @ W_aug; its attention-logit columns come out in f32
                proj = jnp.dot(y.astype(wnext_ref.dtype), wnext_ref[...],
                               preferred_element_type=jnp.float32)
                o_ref[...] = proj.astype(o_ref.dtype)
                osrc_ref[...] = proj[:, next_real:next_real + 1]
                odst_ref[...] = proj[:, next_real + 1:next_real + 2]
            else:
                o_ref[...] = y.astype(o_ref.dtype)

    # h: VMEM-resident (constant index -> single DMA) when it fits, else streamed
    # per nonzero src block via a data-dependent index_map (block-CSR).
    if h_resident:
        h_spec = pl.BlockSpec((n_pad, c_pad), lambda i, j, c, r: (0, 0))
    else:
        h_spec = pl.BlockSpec((tile_src, c_pad),
                              lambda i, j, c, r: (c[i * max_blk + j], 0))

    in_specs = [
        pl.BlockSpec((tile_dst, 1), lambda i, j, c, r: (i, 0)),                    # a_dst f32
        pl.BlockSpec((1, tile_src), lambda i, j, c, r: (0, c[i * max_blk + j])),   # a_src f32
        h_spec,                                                                    # h bf16
        pl.BlockSpec((tile_dst, tile_src),
                     lambda i, j, c, r: (i, c[i * max_blk + j])),                  # adj int8
        pl.BlockSpec((1, c_pad), lambda i, j, c, r: (0, 0)),                       # bias f32
    ]
    args = [cols, row_nnz, a_dst_col, a_src_row, h_aug, adj_p, bias_row]

    if fuse:
        c_next = w_next.shape[1]
        in_specs.append(pl.BlockSpec(w_next.shape, lambda i, j, c, r: (0, 0)))
        args.append(w_next)
        out_shape = (jax.ShapeDtypeStruct((n_pad, c_next), jnp.bfloat16),
                     jax.ShapeDtypeStruct((n_pad, 1), jnp.float32),
                     jax.ShapeDtypeStruct((n_pad, 1), jnp.float32))
        out_specs = [pl.BlockSpec((tile_dst, c_next), lambda i, j, c, r: (i, 0)),
                     pl.BlockSpec((tile_dst, 1), lambda i, j, c, r: (i, 0)),
                     pl.BlockSpec((tile_dst, 1), lambda i, j, c, r: (i, 0))]
    else:
        out_shape = jax.ShapeDtypeStruct((n_pad, c_pad), jnp.float32)
        out_specs = pl.BlockSpec((tile_dst, c_pad), lambda i, j, c, r: (i, 0))

    return pl.pallas_call(
        kernel,
        out_shape=out_shape,
        grid_spec=pltpu.PrefetchScalarGridSpec(
            num_scalar_prefetch=2,                     # cols (block-CSR), row_nnz
            grid=grid,
            in_specs=in_specs,
            out_specs=out_specs,
            scratch_shapes=[pltpu.VMEM((tile_dst, 1), jnp.float32),      # m
                            pltpu.VMEM((tile_dst, 1), jnp.float32),      # l
                            pltpu.VMEM((tile_dst, c_pad), jnp.float32)]),  # acc
        compiler_params=pltpu.CompilerParams(
            dimension_semantics=("parallel", "arbitrary"),
            vmem_limit_bytes=int(vmem_limit)),
    )(*args)


# --------------------- global_mean_pool + fc (Linear), tiled over nodes ---------------------
def pool_fc(x_nodes, pool_mat, fc_w, fc_b, tile_n):
    n_pad, c_pad = x_nodes.shape
    b_pad = pool_mat.shape[0]
    k_pad = fc_w.shape[1]

    def kernel(pool_ref, x_ref, w_ref, b_ref, o_ref, acc_ref):
        i = pl.program_id(0)

        @pl.when(i == 0)
        def _init():
            acc_ref[...] = jnp.zeros_like(acc_ref)

        acc_ref[...] += jnp.dot(pool_ref[...].astype(jnp.float32), x_ref[...],
                                preferred_element_type=jnp.float32)

        @pl.when(i == pl.num_programs(0) - 1)
        def _finish():
            o_ref[...] = jnp.dot(acc_ref[...], w_ref[...],
                                 preferred_element_type=jnp.float32) + b_ref[...]

    return pl.pallas_call(
        kernel,
        out_shape=jax.ShapeDtypeStruct((b_pad, k_pad), jnp.float32),
        grid=(n_pad // tile_n,),
        in_specs=[pl.BlockSpec((b_pad, tile_n), lambda i: (0, i)),
                  pl.BlockSpec((tile_n, c_pad), lambda i: (i, 0)),
                  pl.BlockSpec((c_pad, k_pad), lambda i: (0, 0)),
                  pl.BlockSpec((1, k_pad), lambda i: (0, 0))],
        out_specs=pl.BlockSpec((b_pad, k_pad), lambda i: (0, 0)),
        scratch_shapes=[pltpu.VMEM((b_pad, c_pad), jnp.float32)],
        compiler_params=pltpu.CompilerParams(
            dimension_semantics=("arbitrary",)),
    )(pool_mat, x_nodes, fc_w, fc_b)


# --------------------------------- parameters ---------------------------------
def init_params(key, num_node_features, hidden_channels, num_classes):
    params = {"convs": []}
    dims = [num_node_features] + list(hidden_channels)
    for i in range(len(hidden_channels)):
        key, k1, k2, k3 = jax.random.split(key, 4)
        fan_in, fan_out = dims[i], dims[i + 1]
        params["convs"].append({
            "w": jax.random.normal(k1, (fan_in, fan_out), jnp.float32) * (1.0 / jnp.sqrt(fan_in)),
            "att_src": jax.random.normal(k2, (1, fan_out), jnp.float32) * 0.1,
            "att_dst": jax.random.normal(k3, (1, fan_out), jnp.float32) * 0.1,
            "bias": jnp.zeros((fan_out,), jnp.float32),
        })
    key, kf = jax.random.split(key)
    params["fc_w"] = jax.random.normal(kf, (hidden_channels[-1], num_classes), jnp.float32) \
        * (1.0 / jnp.sqrt(hidden_channels[-1]))
    params["fc_b"] = jnp.zeros((num_classes,), jnp.float32)
    return params


def pad_params(params, num_node_features):
    """Pad weights to lane-dense (128-multiple) shapes and fold the GAT attention vectors
    into two extra output columns of each layer's W (so the MXU computes the logits)."""
    padded = {"w_aug": [], "bias": [], "out_real": []}
    prev_pad = _round_up(num_node_features, LANE)
    for c in params["convs"]:
        f_in, f_out = c["w"].shape
        c_pad = _round_up(f_out + 2, LANE)            # +2 columns for a_src / a_dst logits
        w_aug = jnp.zeros((prev_pad, c_pad), jnp.float32)
        w_aug = w_aug.at[:f_in, :f_out].set(c["w"])
        w_aug = w_aug.at[:f_in, f_out].set(c["w"] @ c["att_src"].reshape(f_out))
        w_aug = w_aug.at[:f_in, f_out + 1].set(c["w"] @ c["att_dst"].reshape(f_out))
        padded["w_aug"].append(w_aug.astype(jnp.bfloat16))
        bias = jnp.zeros((1, c_pad), jnp.float32).at[0, :f_out].set(c["bias"].reshape(-1))
        padded["bias"].append(bias)
        padded["out_real"].append(f_out)
        prev_pad = c_pad
    c_last = params["convs"][-1]["w"].shape[1]
    k = params["fc_w"].shape[1]
    k_pad = _round_up(k, LANE)
    # zero rows >= c_last also neutralize the (harmless) extra aggregated logit columns
    padded["fc_w"] = jnp.zeros((prev_pad, k_pad), jnp.float32).at[:c_last, :k].set(params["fc_w"])
    padded["fc_b"] = jnp.zeros((1, k_pad), jnp.float32).at[0, :k].set(params["fc_b"].reshape(-1))
    padded["num_classes"] = k
    return padded


# --------------------------------- graph preprocessing (once per graph) ---------------------------------
def prepare_graph(adj, pool_mat, tile_dst, tile_src, n_pad):
    """Pad the adjacency, build the block-CSR tables (nonzero src-block indices per dst
    block row) and the bf16 pooling matrix. Depends only on graph structure -> hoisted
    out of the per-forward path."""
    n = adj.shape[0]
    adj_np = np.zeros((n_pad, n_pad), np.int8)
    adj_np[:n, :n] = np.asarray(adj, np.int8)
    nbi, nbj = n_pad // tile_dst, n_pad // tile_src
    blk_any = adj_np.reshape(nbi, tile_dst, nbj, tile_src).any(axis=(1, 3))
    row_nnz = blk_any.sum(axis=1).astype(np.int32)
    max_blk = max(int(row_nnz.max()), 1)
    cols = np.zeros((nbi, max_blk), np.int32)
    for i in range(nbi):
        nz = np.nonzero(blk_any[i])[0].astype(np.int32)
        if nz.size:
            cols[i, :nz.size] = nz
            cols[i, nz.size:] = nz[-1]   # repeat last index -> padded steps cause no re-DMA

    b = pool_mat.shape[0]
    b_pad = _round_up(b, 8)
    pool_p = jnp.zeros((b_pad, n_pad), jnp.bfloat16).at[:b, :n].set(
        jnp.asarray(pool_mat, jnp.float32).astype(jnp.bfloat16))

    return {
        "adj": jnp.asarray(adj_np),                 # int8 (n_pad, n_pad)
        "cols": jnp.asarray(cols.reshape(-1)),      # int32 (nbi * max_blk,)
        "row_nnz": jnp.asarray(row_nnz),            # int32 (nbi,)
        "max_blk": max_blk,
        "pool": pool_p,                             # bf16 (b_pad, n_pad)
        "n": n, "n_pad": n_pad, "b": b,
        "tile_dst": tile_dst, "tile_src": tile_src,
    }


# --------------------------------- model forward ---------------------------------
def gcn_model_forward(padded, x, graph):
    n, f_in = x.shape
    n_pad = graph["n_pad"]
    tile_dst, tile_src = graph["tile_dst"], graph["tile_src"]
    f_pad = padded["w_aug"][0].shape[0]

    # pad node features (padded nodes have zero adjacency rows/cols and zero pool weight)
    x_p = jnp.zeros((n_pad, f_pad), jnp.bfloat16).at[:n, :f_in].set(x.astype(jnp.bfloat16))

    # layer-1 projection: h = x @ [W | W a_src | W a_dst]  (mem-bound -> big row tile)
    proj_tile = 1024 if n_pad % 1024 == 0 else tile_src
    h, asrc, adst = project(x_p, padded["w_aug"][0], padded["out_real"][0], proj_tile)

    vmem_limit = _vmem_budget()
    n_layers = len(padded["w_aug"])
    for k in range(n_layers):
        c_pad = padded["w_aug"][k].shape[1]
        fuse = k + 1 < n_layers
        w_next = padded["w_aug"][k + 1] if fuse else None
        next_real = padded["out_real"][k + 1] if fuse else None
        c_out = w_next.shape[1] if fuse else c_pad

        # VMEM accounting for the h-residency decision (assume double-buffered h).
        fixed = (2 * tile_dst * tile_src            # adjacency tiles (int8)
                 + 2 * tile_src * c_pad * 2         # streamed h_src fallback (bf16)
                 + tile_dst * c_pad * 4             # acc scratch
                 + 2 * tile_dst * c_out * 4         # output tiles
                 + (2 * c_pad * c_out * 2 if fuse else 0))
        h_resident = (2 * n_pad * c_pad * 2 + fixed + (4 << 20)) <= vmem_limit

        outs = gat_aggregate(h, asrc.reshape(1, n_pad), adst, graph["adj"],
                             padded["bias"][k], graph["cols"], graph["row_nnz"],
                             graph["max_blk"], w_next, next_real,
                             tile_dst, tile_src, h_resident, vmem_limit)
        if fuse:
            h, asrc, adst = outs
        else:
            h = outs

    logits = pool_fc(h, graph["pool"], padded["fc_w"], padded["fc_b"], tile_src)
    return logits[:graph["b"], :padded["num_classes"]]


if __name__ == "__main__":
    key = jax.random.PRNGKey(0)

    N = 16                    # total nodes (2 graphs x 8 nodes)
    F_IN = 8                  # num_node_features
    HIDDEN = [16, 32]         # hidden_channels
    NUM_CLASSES = 4
    B = 2                     # graphs in the batch
    NUM_EDGES = 40

    key, kx, ks, kd = jax.random.split(key, 4)
    x = jax.random.normal(kx, (N, F_IN), jnp.float32)

    # random edge_index (2, E) -> dense int8 adjacency (dst, src) with self-loops
    src = jax.random.randint(ks, (NUM_EDGES,), 0, N)
    dst = jax.random.randint(kd, (NUM_EDGES,), 0, N)
    adj = jnp.zeros((N, N), jnp.int8).at[dst, src].set(1)
    adj = adj.at[jnp.arange(N), jnp.arange(N)].set(1)       # add_self_loops=True

    # global_mean_pool: batch assignment -> mean-pooling matrix (rows sum to 1)
    batch = jnp.concatenate([jnp.zeros((N // 2,), jnp.int32),
                             jnp.ones((N - N // 2,), jnp.int32)])
    onehot = (batch[None, :] == jnp.arange(B, dtype=jnp.int32)[:, None]).astype(jnp.float32)
    counts = jnp.maximum(jnp.sum(onehot, axis=1, keepdims=True), 1.0)  # empty-graph guard
    pool_mat = onehot / counts

    n_pad, tile_dst, tile_src = _pick_node_tiling(N)
    graph = prepare_graph(adj, pool_mat, tile_dst, tile_src, n_pad)    # once per graph

    params = init_params(key, F_IN, HIDDEN, NUM_CLASSES)
    padded = pad_params(params, F_IN)

    out = gcn_model_forward(padded, x, graph)
    out = jax.block_until_ready(out)
    assert out.shape == (B, NUM_CLASSES) and out.dtype == jnp.float32
    assert bool(jnp.isfinite(out).all())
    print("KERNEL_OK")
</pallas_src>

<mosaic_0001>
module attributes {stable_mosaic.version = 11 : i64} {
  func.func @kernel(%arg0: i32, %arg1: memref<128x128xbf16, #tpu.memory_space<vmem>>, %arg2: memref<128x128xbf16, #tpu.memory_space<vmem>>, %arg3: memref<128x128xbf16, #tpu.memory_space<vmem>>, %arg4: memref<128x1xf32, #tpu.memory_space<vmem>>, %arg5: memref<128x1xf32, #tpu.memory_space<vmem>>) attributes {dimension_semantics = [#tpu.dimension_semantics<parallel>], iteration_bounds = array<i64: 1>, scalar_prefetch = 0 : i64, scratch_operands = 0 : i64, tpu.core_type = #tpu.core_type<tc>, window_params = [{transform_indices = @transform_0, window_bounds = array<i64: 128, 128>}, {pipeline_mode = #tpu.pipeline_mode<synchronous>, transform_indices = @transform_1, window_bounds = array<i64: 128, 128>}, {transform_indices = @transform_2, window_bounds = array<i64: 128, 128>}, {transform_indices = @transform_3, window_bounds = array<i64: 128, 1>}, {transform_indices = @transform_4, window_bounds = array<i64: 128, 1>}]} {
    %c0 = arith.constant 0 : index
    %c0_0 = arith.constant 0 : index
    %0 = vector.load %arg1[%c0, %c0_0] : memref<128x128xbf16, #tpu.memory_space<vmem>>, vector<128x128xbf16>
    %c0_1 = arith.constant 0 : index
    %c0_2 = arith.constant 0 : index
    %1 = vector.load %arg2[%c0_1, %c0_2] : memref<128x128xbf16, #tpu.memory_space<vmem>>, vector<128x128xbf16>
    %cst = arith.constant dense<0.000000e+00> : vector<128x128xf32>
    %2 = tpu.matmul %0, %1, %cst {dimension_numbers = #tpu.dot_dimension_numbers<[1], [0], [0], [1], [0, 0, 1, 1], [], []>} : vector<128x128xbf16>, vector<128x128xbf16>, vector<128x128xf32> -> vector<128x128xf32>
    %3 = arith.truncf %2 : vector<128x128xf32> to vector<128x128xbf16>
    %c0_3 = arith.constant 0 : index
    %c0_4 = arith.constant 0 : index
    %4 = vector.load %arg3[%c0_3, %c0_4] : memref<128x128xbf16, #tpu.memory_space<vmem>>, vector<128x128xbf16>
    tpu.vector_store %arg3[%c0_3, %c0_4], %3 {strides = array<i32>} : memref<128x128xbf16, #tpu.memory_space<vmem>>, vector<128x128xbf16>,
    %5 = vector.extract_strided_slice %2 {offsets = [0, 16], sizes = [128, 1], strides = [1, 1]} : vector<128x128xf32> to vector<128x1xf32>
    %c0_5 = arith.constant 0 : index
    %c0_6 = arith.constant 0 : index
    %6 = vector.load %arg4[%c0_5, %c0_6] : memref<128x1xf32, #tpu.memory_space<vmem>>, vector<128x1xf32>
    tpu.vector_store %arg4[%c0_5, %c0_6], %5 {strides = array<i32>} : memref<128x1xf32, #tpu.memory_space<vmem>>, vector<128x1xf32>,
    %7 = vector.extract_strided_slice %2 {offsets = [0, 17], sizes = [128, 1], strides = [1, 1]} : vector<128x128xf32> to vector<128x1xf32>
    %c0_7 = arith.constant 0 : index
    %c0_8 = arith.constant 0 : index
    %8 = vector.load %arg5[%c0_7, %c0_8] : memref<128x1xf32, #tpu.memory_space<vmem>>, vector<128x1xf32>
    tpu.vector_store %arg5[%c0_7, %c0_8], %7 {strides = array<i32>} : memref<128x1xf32, #tpu.memory_space<vmem>>, vector<128x1xf32>,
    return
  }
  func.func @transform_0(%arg0: i32) -> (i32, i32) {
    %c0_i32 = arith.constant 0 : i32
    %c0_i32_0 = arith.constant 0 : i32
    return %arg0, %c0_i32 : i32, i32
  }
  func.func @transform_1(%arg0: i32) -> (i32, i32) {
    %c0_i32 = arith.constant 0 : i32
    %c0_i32_0 = arith.constant 0 : i32
    %c0_i32_1 = arith.constant 0 : i32
    return %c0_i32, %c0_i32_0 : i32, i32
  }
  func.func @transform_2(%arg0: i32) -> (i32, i32) {
    %c0_i32 = arith.constant 0 : i32
    %c0_i32_0 = arith.constant 0 : i32
    return %arg0, %c0_i32 : i32, i32
  }
  func.func @transform_3(%arg0: i32) -> (i32, i32) {
    %c0_i32 = arith.constant 0 : i32
    %c0_i32_0 = arith.constant 0 : i32
    return %arg0, %c0_i32 : i32, i32
  }
  func.func @transform_4(%arg0: i32) -> (i32, i32) {
    %c0_i32 = arith.constant 0 : i32
    %c0_i32_0 = arith.constant 0 : i32
    return %arg0, %c0_i32 : i32, i32
  }
}

</mosaic_0001>

<bundles_post_ra>
// kernel: tpu_custom_call.1
= control target key start
LH: loop header
LB: loop body
LE: loop exit
PB: predicated region body
PF: predicated region fallthrough
CT: control target
= control target key end

     0   :  { %10 = vsyncpa [#allocation3], 0  ;;  %s978_s0 = inlined_call_operand.hbm [shape: bf16[128,128], index: 0, kind: input, shape index: {}]   ;;  %s979_s1 = inlined_call_operand.hbm [shape: bf16[128,128], index: 1, kind: input, shape index: {}]   ;;  %s980_s2 = inlined_call_operand.hbm [shape: bf16[128,128], index: 2, kind: output, shape index: {0}]   ;;  %s981_s3 = inlined_call_operand.vmem [shape: f32[128,1], index: 3, kind: output, shape index: {1}]   ;;  %s982_s4 = inlined_call_operand.vmem [shape: f32[128,1], index: 4, kind: output, shape index: {2}]  }
   0x1   :  { %11 = vsyncpa [#allocation6], 0 }
   0x2   :  { %12 = vsyncpa [#allocation4], 0  ;;  %s768_s15 = smov [#allocation2]  }
   0x3   :  { %s18_s16 = sshll.u32 %s768_s15, 4  ;;  %s19_s16 = int_to_ptr.vmem [resolvable:$true] %s18_s16 }
   0x4   :  { %s710_s17 = scalar_lea.vmem %s19_s16, 1024  ;;  %p715_p1 = scmp.lt.s32.totalorder %s19_s16, %s19_s16 }
   0x5   :  { %p711_p0 = scmp.ne.s32.totalorder %s19_s16, %s710_s17  ;;  %p716_p2 = scmp.lt.s32.totalorder %s710_s17, %s710_s17 }
   0x7   :  { %p717_p3 = por %p716_p2, %p715_p1 }
   0x9   :  { %p718_p4 = pnand %p717_p3, %p711_p0 }
   0xb   :  { %721 = shalt.err (!%p718_p4)
}
   0xc   :  { %s769_s18 = smov 64   ;;  %s770_s19 = smov 4  }
   0xd   :  { %24 = dma.hbm_to_vmem [thread:$0]  %s978_s0, 1024, %s19_s16, [#allocation3], %s769_s18, %s769_s18, %s770_s19  }
   0xe   :  { %s771_s22 = smov [#allocation5]  }
   0xf   :  { %s30_s23 = sshll.u32 %s771_s22, 4  ;;  %s31_s23 = int_to_ptr.vmem [resolvable:$true] %s30_s23 }
  0x10   :  { %s730_s24 = scalar_lea.vmem %s31_s23, 1024  ;;  %p735_p6 = scmp.lt.s32.totalorder %s31_s23, %s31_s23 }
  0x11   :  { %p731_p5 = scmp.ne.s32.totalorder %s31_s23, %s730_s24  ;;  %p736_p7 = scmp.lt.s32.totalorder %s730_s24, %s730_s24 }
  0x13   :  { %p737_p8 = por %p736_p7, %p735_p6 }
  0x15   :  { %p738_p9 = pnand %p737_p8, %p731_p5 }
  0x17   :  { %741 = shalt.err (!%p738_p9)
}
  0x18   :  { %36 = dma.hbm_to_vmem [thread:$0]  %s979_s1, 1024, %s31_s23, [#allocation6], %s769_s18, %s769_s18, %s770_s19  }
  0x19   :  { %762 = dma.done.wait [#allocation3], 1024  }
  0x1a   :  { %763 = vsyncadd [#allocation3], 4294966272 }
  0x1b   :  { %764 = dma.done.wait [#allocation6], 1024  }
  0x1c   :  { %765 = vsyncadd [#allocation6], 4294966272  ;;  %v686_v0 = vld [vmem:[#allocation5 + $0x38] sm:$0xff]   ;;  %v687_v1 = vld [vmem:[#allocation5 + $0x30] sm:$0xff]   ;;  %s772_s0 = smov 112   ;;  %s773_s1 = smov 111  }
  0x1d   :  { %631 = vmatprep.subr.bf16.mxu0 %v686_v0  ;;  %663 = vmatprep.subr.bf16.mxu1 %v686_v0  ;;  %v688_v2 = vld [vmem:[#allocation5 + $0x28] sm:$0xff]   ;;  %v689_v3 = vld [vmem:[#allocation5 + $0x20] sm:$0xff]   ;;  %v690_v6 = vld [vmem:[#allocation5 + $0x18] sm:$0xff]   ;;  %s774_s27 = smov [#allocation7]  }
  0x1e   :  { %632 = vmatpush3.bf16.msra.mxu0 %v686_v0  ;;  %671 = vmatpush3.bf16.msra.mxu1 %v686_v0  ;;  %v694_v4 = vld [vmem:[#allocation2] sm:$0xff]   ;;  %v691_v7 = vld [vmem:[#allocation5 + $0x10] sm:$0xff]   ;;  %v692_v8 = vld [vmem:[#allocation5 + $0x8] sm:$0xff]   ;;  %s499_s28 = sshll.u32 %s774_s27, 4  ;;  %s500_s28 = int_to_ptr.vmem [resolvable:$true] %s499_s28 }
  0x1f   :  { %633 = vmatprep.subr.bf16.mxu0 %v687_v1  ;;  %664 = vmatprep.subr.bf16.mxu1 %v687_v1  ;;  %v695_v5 = vld [vmem:[#allocation2 + $0x20] sm:$0xff]   ;;  %v696_v10 = vld [vmem:[#allocation2 + $0x8] sm:$0xff]   ;;  %v698_v12 = vld [vmem:[#allocation2 + $0x10] sm:$0xff]   ;;  %s742_s29 = scalar_lea.vmem %s500_s28, 1024  ;;  %p747_p11 = scmp.lt.s32.totalorder %s500_s28, %s500_s28 }
  0x20   :  { %647 = vmatprep.mubr.bf16.mxu0 %v694_v4  ;;  %655 = vmatprep.mubr.bf16.mxu1 %v695_v5  ;;  %v693_v9 = vld [vmem:[#allocation5] sm:$0xff]   ;;  %v697_v11 = vld [vmem:[#allocation2 + $0x28] sm:$0xff]   ;;  %v700_v13 = vld [vmem:[#allocation2 + $0x30] sm:$0xff]   ;;  %p743_p10 = scmp.ne.s32.totalorder %s500_s28, %s742_s29  ;;  %p748_p12 = scmp.lt.s32.totalorder %s742_s29, %s742_s29 }
  0x21   :  { %v699_v14 = vld [vmem:[#allocation2 + $0x18] sm:$0xff]  }
  0x22   :  { %634 = vmatpush3.bf16.msra.mxu0 %v687_v1  ;;  %672 = vmatpush3.bf16.msra.mxu1 %v687_v1  ;;  %v701_v15 = vld [vmem:[#allocation2 + $0x38] sm:$0xff]   ;;  %p749_p13 = por %p748_p12, %p747_p11 }
  0x23   :  { %635 = vmatprep.subr.bf16.mxu0 %v688_v2  ;;  %665 = vmatprep.subr.bf16.mxu1 %v688_v2 }
  0x24   :  { %p750_p0 = pnand %p749_p13, %p743_p10 }
  0x26   :  { %636 = vmatpush3.bf16.msra.mxu0 %v688_v2  ;;  %673 = vmatpush3.bf16.msra.mxu1 %v688_v2 }
  0x27   :  { %637 = vmatprep.subr.bf16.mxu0 %v689_v3  ;;  %666 = vmatprep.subr.bf16.mxu1 %v689_v3 }
  0x2a   :  { %638 = vmatpush3.bf16.msra.mxu0 %v689_v3  ;;  %674 = vmatpush3.bf16.msra.mxu1 %v689_v3 }
  0x2b   :  { %639 = vmatprep.subr.bf16.mxu0 %v690_v6  ;;  %667 = vmatprep.subr.bf16.mxu1 %v690_v6 }
  0x2e   :  { %640 = vmatpush3.bf16.msra.mxu0 %v690_v6  ;;  %675 = vmatpush3.bf16.msra.mxu1 %v690_v6 }
  0x2f   :  { %641 = vmatprep.subr.bf16.mxu0 %v691_v7  ;;  %668 = vmatprep.subr.bf16.mxu1 %v691_v7 }
  0x32   :  { %642 = vmatpush3.bf16.msra.mxu0 %v691_v7  ;;  %676 = vmatpush3.bf16.msra.mxu1 %v691_v7 }
  0x33   :  { %643 = vmatprep.subr.bf16.mxu0 %v692_v8  ;;  %669 = vmatprep.subr.bf16.mxu1 %v692_v8 }
  0x36   :  { %644 = vmatpush3.bf16.msra.mxu0 %v692_v8  ;;  %677 = vmatpush3.bf16.msra.mxu1 %v692_v8 }
  0x37   :  { %645 = vmatprep.subr.bf16.mxu0 %v693_v9  ;;  %670 = vmatprep.subr.bf16.mxu1 %v693_v9 }
  0x3a   :  { %646 = vmatpush3.bf16.msra.mxu0 %v693_v9  ;;  %678 = vmatpush3.bf16.msra.mxu1 %v693_v9 }
  0x3d   :  { %648 = vmatmul.mubr.bf16.vlgmr.msra.gmra.mxu0 %v696_v10  ;;  %656 = vmatmul.mubr.bf16.vlgmr.msra.gmra.mxu1 %v697_v11 }
  0x3e   :  { %651 = vmatprep.mubr.bf16.mxu0 %v698_v12  ;;  %659 = vmatprep.mubr.bf16.mxu1 %v700_v13 }
  0x45   :  { %652 = vmatmul.mubr.bf16.gmra.mxu0 %v699_v14  ;;  %660 = vmatmul.mubr.bf16.gmra.mxu1 %v701_v15 }
  0xfd   :  { %v649_v16 = vpop.f32.mrf.mxu0  ;;  %v657_v17 = vpop.f32.mrf.mxu1 }
  0xfe   :  { %385 = vrot.lane.b32.xlu0 %v657_v17, %s772_s0  ;;  %369 = vrot.lane.b32.xlu1 %v649_v16, %s772_s0 }
  0xff   :  { %v206_v18 = vpop.f32.mrf.mxu0  ;;  %v238_v19 = vpop.f32.mrf.mxu1 }
 0x101   :  { %v650_v20 = vpop.f32.mrf.mxu0  ;;  %v658_v21 = vpop.f32.mrf.mxu1 }
 0x102   :  { %v576_v22 = vpack.c.bf16 %v650_v20, %v649_v16  ;;  %v596_v23 = vpack.c.bf16 %v658_v21, %v657_v17  ;;  %434 = vrot.lane.b32.xlu0 %v649_v16, %s773_s1  ;;  %371 = vrot.lane.b32.xlu1 %v650_v20, %s772_s0 }
 0x103   :  { %v209_v24 = vpop.f32.mrf.mxu0  ;;  %v241_v25 = vpop.f32.mrf.mxu1 }
 0x104   :  { %608 = vst [vmem:[#allocation7 + $0x8] sm:$0xff] %v576_v22   ;;  %612 = vst [vmem:[#allocation7 + $0x28] sm:$0xff] %v596_v23   ;;  %v571_v26 = vpack.c.bf16 %v209_v24, %v206_v18  ;;  %v591_v27 = vpack.c.bf16 %v241_v25, %v238_v19 }
 0x105   :  { %v653_v28 = vpop.f32.mrf.mxu0  ;;  %v661_v29 = vpop.f32.mrf.mxu1 }
 0x106   :  { %572 = vst [vmem:[#allocation7] sm:$0xff] %v571_v26   ;;  %611 = vst [vmem:[#allocation7 + $0x20] sm:$0xff] %v591_v27   ;;  %450 = vrot.lane.b32.xlu0 %v657_v17, %s773_s1  ;;  %387 = vrot.lane.b32.xlu1 %v658_v21, %s772_s0 }
 0x107   :  { %v222_v30 = vpop.f32.mrf.mxu0  ;;  %v254_v31 = vpop.f32.mrf.mxu1 }
 0x109   :  { %v654_v32 = vpop.f32.mrf.mxu0  ;;  %v662_v33 = vpop.f32.mrf.mxu1 }
 0x10a   :  { %365 = vrot.lane.b32.xlu0 %v206_v18, %s772_s0  ;;  %436 = vrot.lane.b32.xlu1 %v650_v20, %s773_s1  ;;  %v586_v34 = vpack.c.bf16 %v654_v32, %v653_v28  ;;  %v606_v35 = vpack.c.bf16 %v662_v33, %v661_v29 }
 0x10b   :  { %v225_v36 = vpop.f32.mrf.mxu0  ;;  %v257_v37 = vpop.f32.mrf.mxu1 }
 0x10c   :  { %610 = vst [vmem:[#allocation7 + $0x18] sm:$0xff] %v586_v34   ;;  %v581_v38 = vpack.c.bf16 %v225_v36, %v222_v30  ;;  %614 = vst [vmem:[#allocation7 + $0x38] sm:$0xff] %v606_v35   ;;  %v601_v39 = vpack.c.bf16 %v257_v37, %v254_v31 }
 0x10e   :  { %381 = vrot.lane.b32.xlu0 %v238_v19, %s772_s0  ;;  %452 = vrot.lane.b32.xlu1 %v658_v21, %s773_s1  ;;  %609 = vst [vmem:[#allocation7 + $0x10] sm:$0xff] %v581_v38   ;;  %613 = vst [vmem:[#allocation7 + $0x30] sm:$0xff] %v601_v39  }
 0x112   :  { %430 = vrot.lane.b32.xlu0 %v206_v18, %s773_s1  ;;  %383 = vrot.lane.b32.xlu1 %v241_v25, %s772_s0 }
 0x116   :  { %446 = vrot.lane.b32.xlu0 %v238_v19, %s773_s1  ;;  %432 = vrot.lane.b32.xlu1 %v209_v24, %s773_s1 }
 0x11a   :  { %448 = vrot.lane.b32.xlu1 %v241_v25, %s773_s1  ;;  %367 = vrot.lane.b32.xlu0 %v209_v24, %s772_s0 }
 0x11e   :  { %377 = vrot.lane.b32.xlu0 %v653_v28, %s772_s0  ;;  %379 = vrot.lane.b32.xlu1 %v654_v32, %s772_s0 }
 0x122   :  { %393 = vrot.lane.b32.xlu0 %v661_v29, %s772_s0  ;;  %395 = vrot.lane.b32.xlu1 %v662_v33, %s772_s0 }
 0x126   :  { %442 = vrot.lane.b32.xlu0 %v653_v28, %s773_s1  ;;  %444 = vrot.lane.b32.xlu1 %v654_v32, %s773_s1 }
 0x12a   :  { %373 = vrot.lane.b32.xlu0 %v222_v30, %s772_s0  ;;  %375 = vrot.lane.b32.xlu1 %v225_v36, %s772_s0 }
 0x12b   :  { %753 = shalt.err (!%p750_p0)
}
 0x12c   :  { %505 = dma.vmem_to_hbm [thread:$0]  %s500_s28, 1024, %s980_s2, [#allocation4], %s769_s18, %s769_s18, %s770_s19   ;;  %vm413_vm0 = vcmask 7168  }
 0x12e   :  { %389 = vrot.lane.b32.xlu0 %v254_v31, %s772_s0  ;;  %391 = vrot.lane.b32.xlu1 %v257_v37, %s772_s0 }
 0x132   :  { %438 = vrot.lane.b32.xlu0 %v222_v30, %s773_s1  ;;  %440 = vrot.lane.b32.xlu1 %v225_v36, %s773_s1 }
 0x136   :  { %454 = vrot.lane.b32.xlu0 %v254_v31, %s773_s1  ;;  %456 = vrot.lane.b32.xlu1 %v257_v37, %s773_s1 }
 0x13a   :  { %458 = vrot.lane.b32.xlu0 %v661_v29, %s773_s1  ;;  %460 = vrot.lane.b32.xlu1 %v662_v33, %s773_s1 }
 0x170   :  { %v386_v40 = vpop.permute.xlu0 %385  ;;  %v370_v41 = vpop.permute.xlu1 %369 }
 0x171   :  { %424 = vst.msk [vmem:[%s981_s3 + $0x50] sm:$0xff] %vm413_vm0, %v386_v40  ;;  %416 = vst.msk [vmem:[%s981_s3 + $0x10] sm:$0xff] %vm413_vm0, %v370_v41 }
 0x174   :  { %v435_v42 = vpop.permute.xlu0 %434  ;;  %v372_v43 = vpop.permute.xlu1 %371 }
 0x175   :  { %480 = vst.msk [vmem:[%s982_s4 + $0x10] sm:$0xff] %vm413_vm0, %v435_v42  ;;  %417 = vst.msk [vmem:[%s981_s3 + $0x18] sm:$0xff] %vm413_vm0, %v372_v43 }
 0x178   :  { %v451_v44 = vpop.permute.xlu0 %450  ;;  %v388_v45 = vpop.permute.xlu1 %387 }
 0x179   :  { %488 = vst.msk [vmem:[%s982_s4 + $0x50] sm:$0xff] %vm413_vm0, %v451_v44  ;;  %425 = vst.msk [vmem:[%s981_s3 + $0x58] sm:$0xff] %vm413_vm0, %v388_v45 }
 0x17c   :  { %v366_v46 = vpop.permute.xlu0 %365  ;;  %v437_v47 = vpop.permute.xlu1 %436 }
 0x17d   :  { %414 = vst.msk [vmem:[%s981_s3] sm:$0xff] %vm413_vm0, %v366_v46  ;;  %481 = vst.msk [vmem:[%s982_s4 + $0x18] sm:$0xff] %vm413_vm0, %v437_v47 }
 0x180   :  { %v382_v48 = vpop.permute.xlu0 %381  ;;  %v453_v49 = vpop.permute.xlu1 %452 }
 0x181   :  { %422 = vst.msk [vmem:[%s981_s3 + $0x40] sm:$0xff] %vm413_vm0, %v382_v48  ;;  %489 = vst.msk [vmem:[%s982_s4 + $0x58] sm:$0xff] %vm413_vm0, %v453_v49 }
 0x184   :  { %v431_v50 = vpop.permute.xlu0 %430  ;;  %v384_v51 = vpop.permute.xlu1 %383 }
 0x185   :  { %478 = vst.msk [vmem:[%s982_s4] sm:$0xff] %vm413_vm0, %v431_v50  ;;  %423 = vst.msk [vmem:[%s981_s3 + $0x48] sm:$0xff] %vm413_vm0, %v384_v51 }
 0x188   :  { %v447_v52 = vpop.permute.xlu0 %446  ;;  %v433_v53 = vpop.permute.xlu1 %432 }
 0x189   :  { %486 = vst.msk [vmem:[%s982_s4 + $0x40] sm:$0xff] %vm413_vm0, %v447_v52  ;;  %479 = vst.msk [vmem:[%s982_s4 + $0x8] sm:$0xff] %vm413_vm0, %v433_v53 }
 0x18c   :  { %v449_v54 = vpop.permute.xlu1 %448  ;;  %v368_v55 = vpop.permute.xlu0 %367 }
 0x18d   :  { %487 = vst.msk [vmem:[%s982_s4 + $0x48] sm:$0xff] %vm413_vm0, %v449_v54  ;;  %415 = vst.msk [vmem:[%s981_s3 + $0x8] sm:$0xff] %vm413_vm0, %v368_v55 }
 0x190   :  { %v378_v56 = vpop.permute.xlu0 %377  ;;  %v380_v57 = vpop.permute.xlu1 %379 }
 0x191   :  { %420 = vst.msk [vmem:[%s981_s3 + $0x30] sm:$0xff] %vm413_vm0, %v378_v56  ;;  %421 = vst.msk [vmem:[%s981_s3 + $0x38] sm:$0xff] %vm413_vm0, %v380_v57 }
 0x194   :  { %v394_v58 = vpop.permute.xlu0 %393  ;;  %v396_v59 = vpop.permute.xlu1 %395 }
 0x195   :  { %428 = vst.msk [vmem:[%s981_s3 + $0x70] sm:$0xff] %vm413_vm0, %v394_v58  ;;  %429 = vst.msk [vmem:[%s981_s3 + $0x78] sm:$0xff] %vm413_vm0, %v396_v59 }
 0x198   :  { %v443_v60 = vpop.permute.xlu0 %442  ;;  %v445_v61 = vpop.permute.xlu1 %444 }
 0x199   :  { %484 = vst.msk [vmem:[%s982_s4 + $0x30] sm:$0xff] %vm413_vm0, %v443_v60  ;;  %485 = vst.msk [vmem:[%s982_s4 + $0x38] sm:$0xff] %vm413_vm0, %v445_v61 }
 0x19c   :  { %v374_v62 = vpop.permute.xlu0 %373  ;;  %v376_v63 = vpop.permute.xlu1 %375 }
 0x19d   :  { %418 = vst.msk [vmem:[%s981_s3 + $0x20] sm:$0xff] %vm413_vm0, %v374_v62  ;;  %419 = vst.msk [vmem:[%s981_s3 + $0x28] sm:$0xff] %vm413_vm0, %v376_v63 }
 0x1a0   :  { %v390_v0 = vpop.permute.xlu0 %389  ;;  %v392_v1 = vpop.permute.xlu1 %391 }
 0x1a1   :  { %426 = vst.msk [vmem:[%s981_s3 + $0x60] sm:$0xff] %vm413_vm0, %v390_v0  ;;  %427 = vst.msk [vmem:[%s981_s3 + $0x68] sm:$0xff] %vm413_vm0, %v392_v1 }
 0x1a4   :  { %v439_v2 = vpop.permute.xlu0 %438  ;;  %v441_v3 = vpop.permute.xlu1 %440 }
 0x1a5   :  { %482 = vst.msk [vmem:[%s982_s4 + $0x20] sm:$0xff] %vm413_vm0, %v439_v2  ;;  %483 = vst.msk [vmem:[%s982_s4 + $0x28] sm:$0xff] %vm413_vm0, %v441_v3 }
 0x1a8   :  { %v455_v4 = vpop.permute.xlu0 %454  ;;  %v457_v5 = vpop.permute.xlu1 %456 }
 0x1a9   :  { %490 = vst.msk [vmem:[%s982_s4 + $0x60] sm:$0xff] %vm413_vm0, %v455_v4  ;;  %491 = vst.msk [vmem:[%s982_s4 + $0x68] sm:$0xff] %vm413_vm0, %v457_v5 }
 0x1ac   :  { %v459_v6 = vpop.permute.xlu0 %458  ;;  %v461_v7 = vpop.permute.xlu1 %460 }
 0x1ad   :  { %492 = vst.msk [vmem:[%s982_s4 + $0x70] sm:$0xff] %vm413_vm0, %v459_v6  ;;  %493 = vst.msk [vmem:[%s982_s4 + $0x78] sm:$0xff] %vm413_vm0, %v461_v7 }
 0x1ae   :  { %766 = dma.done.wait [#allocation4], 1024  }
 0x1af   :  { %767 = vsyncadd [#allocation4], 4294966272 }
 0x1b0   :  { %517 = vsyncpa [#allocation3], 1 }
 0x1b1   :  { %518 = vsyncpa [#allocation6], 1 }
 0x1b2   :  { %519 = vsyncpa [#allocation4], 1 }

</bundles_post_ra>
